<compile_context>
chip_gen: v6e
topology: v6e:2x2x1
jax: 0.10.0
libtpu: 0.0.40
codegen_flags: <defaults>
</compile_context>

<pallas_src>
import functools
import math

import jax
import jax.numpy as jnp
from jax.experimental import pallas as pl
from jax.experimental.pallas import tpu as pltpu


_MAX_TILE_B = 2048                       # rows per grid step (multiple of 8)
_VMEM_LIMIT_BYTES = 32 * 1024 * 1024     # explicit: v5e default is only 16 MiB


# ----------------------------- Pallas kernel ------------------------------- #
def _gaussian_dynamics_kernel(obs_ref, act_ref, w1o_ref, w1a_ref, w2_ref,
                              wloc_ref, wsc_ref, b_ref, loc_ref, scale_ref,
                              *, hidden, obs_size):
    w_dtype = w2_ref.dtype

    b = b_ref[...]                                   # (1, 2*hidden + 2*obs), f32
    b1 = b[:, :hidden]
    b2 = b[:, hidden:2 * hidden]
    bloc = b[:, 2 * hidden:2 * hidden + obs_size]
    bsc = b[:, 2 * hidden + obs_size:]

    # Cast activations in-kernel (no extra HBM pass when compute_dtype=bf16).
    obs = obs_ref[...].astype(w_dtype)
    act = act_ref[...].astype(w_dtype)

    # --- encoder layer 1: obs @ W1o + act @ W1a + b1 == concat @ W1 + b1 ---
    h1 = (jnp.dot(obs, w1o_ref[...], preferred_element_type=jnp.float32)
          + jnp.dot(act, w1a_ref[...], preferred_element_type=jnp.float32)
          + b1)
    h1 = jnp.maximum(h1, 0.0).astype(w_dtype)

    # --- encoder layer 2 ---
    h2 = jnp.dot(h1, w2_ref[...], preferred_element_type=jnp.float32) + b2
    h2 = jnp.maximum(h2, 0.0).astype(w_dtype)

    # --- heads (two small matmuls; MXU has huge slack) ---
    loc = jnp.dot(h2, wloc_ref[...], preferred_element_type=jnp.float32) + bloc
    pre = jnp.dot(h2, wsc_ref[...], preferred_element_type=jnp.float32) + bsc
    # numerically-stable softplus
    scale = jnp.maximum(pre, 0.0) + jnp.log1p(jnp.exp(-jnp.abs(pre)))

    loc_ref[...] = loc.astype(loc_ref.dtype)
    scale_ref[...] = scale.astype(scale_ref.dtype)


# ------------------------------ parameters --------------------------------- #
def _linear_init(key, fan_in, fan_out):
    """PyTorch nn.Linear default init: U(-1/sqrt(fan_in), 1/sqrt(fan_in)).
    Weight returned pre-transposed as (fan_in, fan_out); bias (1, fan_out)."""
    kw, kb = jax.random.split(key)
    bound = 1.0 / math.sqrt(fan_in)
    w = jax.random.uniform(kw, (fan_in, fan_out), jnp.float32, -bound, bound)
    b = jax.random.uniform(kb, (1, fan_out), jnp.float32, -bound, bound)
    return w, b


def init_gaussian_dynamics_params(key, obs_size, act_size, hidden=32):
    k1, k2, k3, k4 = jax.random.split(key, 4)
    w1, b1 = _linear_init(k1, obs_size + act_size, hidden)   # encoder layer 1
    w2, b2 = _linear_init(k2, hidden, hidden)                # encoder layer 2
    wloc, bloc = _linear_init(k3, hidden, obs_size)          # loc head
    wsc, bsc = _linear_init(k4, hidden, obs_size)            # input-dependent scale head
    return dict(w1=w1, b1=b1, w2=w2, b2=b2,
                wloc=wloc, bloc=bloc, wsc=wsc, bsc=bsc)


# ------------------------------- wrapper ------------------------------------ #
def _round_up(x, m):
    return ((x + m - 1) // m) * m


def gaussian_dynamics_params(params, obs, actions, *,
                             compute_dtype=jnp.float32,
                             out_dtype=jnp.float32):
    """Forward pass of GaussianDynamicsParams. Returns {'loc': ..., 'scale': ...}."""
    batch, obs_size = obs.shape
    act_size = actions.shape[-1]
    hidden = params["w2"].shape[0]
    in_feat = obs_size + act_size

    # Split layer-1 weight so obs/actions feed the kernel directly (no concat).
    w1o = params["w1"][:obs_size, :].astype(compute_dtype)   # (obs_size, hidden)
    w1a = params["w1"][obs_size:, :].astype(compute_dtype)   # (act_size, hidden)
    w2 = params["w2"].astype(compute_dtype)
    wloc = params["wloc"].astype(compute_dtype)
    wsc = params["wsc"].astype(compute_dtype)
    # Pack all biases into one small resident buffer (one DMA stream).
    b_all = jnp.concatenate(
        [params["b1"], params["b2"], params["bloc"], params["bsc"]],
        axis=1).astype(jnp.float32)                          # (1, 2*hidden + 2*obs)

    # --- batch tiling: single tile for small batches; else balanced tiles,
    # an even count of them so v7x's 2 TensorCores get equal work.
    if batch <= _MAX_TILE_B:
        tile_b = batch
    else:
        num_tiles = pl.cdiv(batch, _MAX_TILE_B)
        if num_tiles % 2:
            num_tiles += 1
        tile_b = _round_up(pl.cdiv(batch, num_tiles), 8)
    num_tiles = pl.cdiv(batch, tile_b)

    # Deeper pipelining of the streamed (per-tile) operands on long grids.
    if num_tiles >= 3:
        def _stream_spec(shape, imap):
            return pl.BlockSpec(shape, imap, pipeline_mode=pl.Buffered(3))
    else:
        def _stream_spec(shape, imap):
            return pl.BlockSpec(shape, imap)

    in_dt = jnp.dtype(obs.dtype).itemsize
    w_dt = jnp.dtype(compute_dtype).itemsize
    o_dt = jnp.dtype(out_dtype).itemsize
    weight_elems = in_feat * hidden + hidden * hidden + 2 * hidden * obs_size
    cost = pl.CostEstimate(
        flops=2 * batch * weight_elems,
        transcendentals=2 * batch * obs_size,                 # exp + log1p per scale lane
        bytes_accessed=(batch * in_feat * in_dt               # obs + actions
                        + weight_elems * w_dt                 # resident weights
                        + (2 * hidden + 2 * obs_size) * 4     # packed biases
                        + 2 * batch * obs_size * o_dt))       # loc + scale

    kernel = functools.partial(_gaussian_dynamics_kernel,
                               hidden=hidden, obs_size=obs_size)

    loc, scale = pl.pallas_call(
        kernel,
        out_shape=(jax.ShapeDtypeStruct((batch, obs_size), out_dtype),
                   jax.ShapeDtypeStruct((batch, obs_size), out_dtype)),
        grid=(num_tiles,),
        in_specs=[
            _stream_spec((tile_b, obs_size), lambda i: (i, 0)),           # obs tile
            _stream_spec((tile_b, act_size), lambda i: (i, 0)),           # actions tile
            pl.BlockSpec((obs_size, hidden), lambda i: (0, 0)),           # w1_obs (resident)
            pl.BlockSpec((act_size, hidden), lambda i: (0, 0)),           # w1_act (resident)
            pl.BlockSpec((hidden, hidden), lambda i: (0, 0)),             # w2 (resident)
            pl.BlockSpec((hidden, obs_size), lambda i: (0, 0)),           # wloc (resident)
            pl.BlockSpec((hidden, obs_size), lambda i: (0, 0)),           # wsc (resident)
            pl.BlockSpec((1, 2 * hidden + 2 * obs_size), lambda i: (0, 0)),  # packed biases
        ],
        out_specs=(_stream_spec((tile_b, obs_size), lambda i: (i, 0)),    # loc
                   _stream_spec((tile_b, obs_size), lambda i: (i, 0))),   # scale
        compiler_params=pltpu.CompilerParams(
            dimension_semantics=("parallel",),
            vmem_limit_bytes=_VMEM_LIMIT_BYTES),
        cost_estimate=cost,
    )(obs, actions, w1o, w1a, w2, wloc, wsc, b_all)

    return {"loc": loc, "scale": scale}


# ------------------------------ reference ----------------------------------- #
def _reference(params, obs, actions):
    x = jnp.concatenate([obs, actions], axis=-1)
    h = jax.nn.relu(x @ params["w1"] + params["b1"])
    h = jax.nn.relu(h @ params["w2"] + params["b2"])
    loc = h @ params["wloc"] + params["bloc"]
    scale = jax.nn.softplus(h @ params["wsc"] + params["bsc"])
    return {"loc": loc, "scale": scale}


if __name__ == "__main__":
    OBS_SIZE, ACT_SIZE, HIDDEN, BATCH = 4, 2, 32, 2

    key = jax.random.PRNGKey(0)
    k_params, k_obs, k_act, k_obs2, k_act2, k_obs3, k_act3 = jax.random.split(key, 7)

    params = init_gaussian_dynamics_params(k_params, OBS_SIZE, ACT_SIZE, HIDDEN)

    # --- small batch (single grid step), f32 ---
    obs = jax.random.normal(k_obs, (BATCH, OBS_SIZE), jnp.float32)
    actions = jax.random.normal(k_act, (BATCH, ACT_SIZE), jnp.float32)

    out = gaussian_dynamics_params(params, obs, actions)
    jax.block_until_ready(out)
    ref = _reference(params, obs, actions)

    assert out["loc"].shape == (BATCH, OBS_SIZE)
    assert out["scale"].shape == (BATCH, OBS_SIZE)
    assert jnp.allclose(out["loc"], ref["loc"], atol=1e-5, rtol=1e-5)
    assert jnp.allclose(out["scale"], ref["scale"], atol=1e-5, rtol=1e-5)
    assert bool(jnp.all(out["scale"] > 0.0))

    # --- multi-tile grid (2 balanced tiles, partial rows in the last one) ---
    BIG = 2600
    obs_b = jax.random.normal(k_obs2, (BIG, OBS_SIZE), jnp.float32)
    act_b = jax.random.normal(k_act2, (BIG, ACT_SIZE), jnp.float32)

    out_b = gaussian_dynamics_params(params, obs_b, act_b)
    jax.block_until_ready(out_b)
    ref_b = _reference(params, obs_b, act_b)
    assert jnp.allclose(out_b["loc"], ref_b["loc"], atol=1e-4, rtol=1e-4)
    assert jnp.allclose(out_b["scale"], ref_b["scale"], atol=1e-4, rtol=1e-4)
    assert bool(jnp.all(out_b["scale"] > 0.0))

    # --- longer grid exercising the pl.Buffered(3) activation/output streams ---
    HUGE = 6600   # -> 4 balanced tiles (even split for v7x megacore)
    obs_h = jax.random.normal(k_obs3, (HUGE, OBS_SIZE), jnp.float32)
    act_h = jax.random.normal(k_act3, (HUGE, ACT_SIZE), jnp.float32)

    out_h = gaussian_dynamics_params(params, obs_h, act_h)
    jax.block_until_ready(out_h)
    ref_h = _reference(params, obs_h, act_h)
    assert jnp.allclose(out_h["loc"], ref_h["loc"], atol=1e-4, rtol=1e-4)
    assert jnp.allclose(out_h["scale"], ref_h["scale"], atol=1e-4, rtol=1e-4)
    assert bool(jnp.all(out_h["scale"] > 0.0))

    # --- bf16 matmul operands + bf16 outputs (bandwidth path for v6e/v7x) ---
    out_bf = gaussian_dynamics_params(params, obs_b, act_b,
                                      compute_dtype=jnp.bfloat16,
                                      out_dtype=jnp.bfloat16)
    jax.block_until_ready(out_bf)
    assert jnp.allclose(out_bf["loc"].astype(jnp.float32), ref_b["loc"],
                        atol=5e-2, rtol=5e-2)
    assert jnp.allclose(out_bf["scale"].astype(jnp.float32), ref_b["scale"],
                        atol=5e-2, rtol=5e-2)
    assert bool(jnp.all(out_bf["scale"] > 0.0))

    print("KERNEL_OK")
</pallas_src>

<mosaic_0001>
module attributes {stable_mosaic.version = 11 : i64} {
  func.func @_gaussian_dynamics_kernel(%arg0: i32, %arg1: memref<2x4xf32, #tpu.memory_space<vmem>>, %arg2: memref<2x2xf32, #tpu.memory_space<vmem>>, %arg3: memref<4x32xf32, #tpu.memory_space<vmem>>, %arg4: memref<2x32xf32, #tpu.memory_space<vmem>>, %arg5: memref<32x32xf32, #tpu.memory_space<vmem>>, %arg6: memref<32x4xf32, #tpu.memory_space<vmem>>, %arg7: memref<32x4xf32, #tpu.memory_space<vmem>>, %arg8: memref<1x72xf32, #tpu.memory_space<vmem>>, %arg9: memref<2x4xf32, #tpu.memory_space<vmem>>, %arg10: memref<2x4xf32, #tpu.memory_space<vmem>>) attributes {dimension_semantics = [#tpu.dimension_semantics<parallel>], iteration_bounds = array<i64: 1>, scalar_prefetch = 0 : i64, scratch_operands = 0 : i64, tpu.core_type = #tpu.core_type<tc>, window_params = [{transform_indices = @transform_0, window_bounds = array<i64: 2, 4>}, {transform_indices = @transform_1, window_bounds = array<i64: 2, 2>}, {pipeline_mode = #tpu.pipeline_mode<synchronous>, transform_indices = @transform_2, window_bounds = array<i64: 4, 32>}, {pipeline_mode = #tpu.pipeline_mode<synchronous>, transform_indices = @transform_3, window_bounds = array<i64: 2, 32>}, {pipeline_mode = #tpu.pipeline_mode<synchronous>, transform_indices = @transform_4, window_bounds = array<i64: 32, 32>}, {pipeline_mode = #tpu.pipeline_mode<synchronous>, transform_indices = @transform_5, window_bounds = array<i64: 32, 4>}, {pipeline_mode = #tpu.pipeline_mode<synchronous>, transform_indices = @transform_6, window_bounds = array<i64: 32, 4>}, {pipeline_mode = #tpu.pipeline_mode<synchronous>, transform_indices = @transform_7, window_bounds = array<i64: 1, 72>}, {transform_indices = @transform_8, window_bounds = array<i64: 2, 4>}, {transform_indices = @transform_9, window_bounds = array<i64: 2, 4>}]} {
    %c0 = arith.constant 0 : index
    %c0_0 = arith.constant 0 : index
    %0 = vector.load %arg8[%c0, %c0_0] : memref<1x72xf32, #tpu.memory_space<vmem>>, vector<1x72xf32>
    %1 = vector.extract_strided_slice %0 {offsets = [0, 0], sizes = [1, 32], strides = [1, 1]} : vector<1x72xf32> to vector<1x32xf32>
    %2 = vector.extract_strided_slice %0 {offsets = [0, 32], sizes = [1, 32], strides = [1, 1]} : vector<1x72xf32> to vector<1x32xf32>
    %3 = vector.extract_strided_slice %0 {offsets = [0, 64], sizes = [1, 4], strides = [1, 1]} : vector<1x72xf32> to vector<1x4xf32>
    %4 = vector.extract_strided_slice %0 {offsets = [0, 68], sizes = [1, 4], strides = [1, 1]} : vector<1x72xf32> to vector<1x4xf32>
    %c0_1 = arith.constant 0 : index
    %c0_2 = arith.constant 0 : index
    %5 = vector.load %arg1[%c0_1, %c0_2] : memref<2x4xf32, #tpu.memory_space<vmem>>, vector<2x4xf32>
    %c0_3 = arith.constant 0 : index
    %c0_4 = arith.constant 0 : index
    %6 = vector.load %arg2[%c0_3, %c0_4] : memref<2x2xf32, #tpu.memory_space<vmem>>, vector<2x2xf32>
    %c0_5 = arith.constant 0 : index
    %c0_6 = arith.constant 0 : index
    %7 = vector.load %arg3[%c0_5, %c0_6] : memref<4x32xf32, #tpu.memory_space<vmem>>, vector<4x32xf32>
    %cst = arith.constant dense<0.000000e+00> : vector<2x32xf32>
    %8 = tpu.matmul %5, %7, %cst {dimension_numbers = #tpu.dot_dimension_numbers<[1], [0], [0], [1], [0, 0, 1, 1], [], []>} : vector<2x4xf32>, vector<4x32xf32>, vector<2x32xf32> -> vector<2x32xf32>
    %c0_7 = arith.constant 0 : index
    %c0_8 = arith.constant 0 : index
    %9 = vector.load %arg4[%c0_7, %c0_8] : memref<2x32xf32, #tpu.memory_space<vmem>>, vector<2x32xf32>
    %cst_9 = arith.constant dense<0.000000e+00> : vector<2x32xf32>
    %10 = tpu.matmul %6, %9, %cst_9 {dimension_numbers = #tpu.dot_dimension_numbers<[1], [0], [0], [1], [0, 0, 1, 1], [], []>} : vector<2x2xf32>, vector<2x32xf32>, vector<2x32xf32> -> vector<2x32xf32>
    %11 = arith.addf %8, %10 : vector<2x32xf32>
    %12 = vector.broadcast %1 : vector<1x32xf32> to vector<2x32xf32>
    %13 = arith.addf %11, %12 : vector<2x32xf32>
    %cst_10 = arith.constant 0.000000e+00 : f32
    %14 = vector.broadcast %cst_10 : f32 to vector<2x32xf32>
    %15 = arith.maximumf %13, %14 : vector<2x32xf32>
    %c0_11 = arith.constant 0 : index
    %c0_12 = arith.constant 0 : index
    %16 = vector.load %arg5[%c0_11, %c0_12] : memref<32x32xf32, #tpu.memory_space<vmem>>, vector<32x32xf32>
    %cst_13 = arith.constant dense<0.000000e+00> : vector<2x32xf32>
    %17 = tpu.matmul %15, %16, %cst_13 {dimension_numbers = #tpu.dot_dimension_numbers<[1], [0], [0], [1], [0, 0, 1, 1], [], []>} : vector<2x32xf32>, vector<32x32xf32>, vector<2x32xf32> -> vector<2x32xf32>
    %18 = vector.broadcast %2 : vector<1x32xf32> to vector<2x32xf32>
    %19 = arith.addf %17, %18 : vector<2x32xf32>
    %cst_14 = arith.constant 0.000000e+00 : f32
    %20 = vector.broadcast %cst_14 : f32 to vector<2x32xf32>
    %21 = arith.maximumf %19, %20 : vector<2x32xf32>
    %c0_15 = arith.constant 0 : index
    %c0_16 = arith.constant 0 : index
    %22 = vector.load %arg6[%c0_15, %c0_16] : memref<32x4xf32, #tpu.memory_space<vmem>>, vector<32x4xf32>
    %cst_17 = arith.constant dense<0.000000e+00> : vector<2x4xf32>
    %23 = tpu.matmul %21, %22, %cst_17 {dimension_numbers = #tpu.dot_dimension_numbers<[1], [0], [0], [1], [0, 0, 1, 1], [], []>} : vector<2x32xf32>, vector<32x4xf32>, vector<2x4xf32> -> vector<2x4xf32>
    %24 = vector.broadcast %3 : vector<1x4xf32> to vector<2x4xf32>
    %25 = arith.addf %23, %24 : vector<2x4xf32>
    %c0_18 = arith.constant 0 : index
    %c0_19 = arith.constant 0 : index
    %26 = vector.load %arg7[%c0_18, %c0_19] : memref<32x4xf32, #tpu.memory_space<vmem>>, vector<32x4xf32>
    %cst_20 = arith.constant dense<0.000000e+00> : vector<2x4xf32>
    %27 = tpu.matmul %21, %26, %cst_20 {dimension_numbers = #tpu.dot_dimension_numbers<[1], [0], [0], [1], [0, 0, 1, 1], [], []>} : vector<2x32xf32>, vector<32x4xf32>, vector<2x4xf32> -> vector<2x4xf32>
    %28 = vector.broadcast %4 : vector<1x4xf32> to vector<2x4xf32>
    %29 = arith.addf %27, %28 : vector<2x4xf32>
    %cst_21 = arith.constant 0.000000e+00 : f32
    %30 = vector.broadcast %cst_21 : f32 to vector<2x4xf32>
    %31 = arith.maximumf %29, %30 : vector<2x4xf32>
    %32 = math.absf %29 : vector<2x4xf32>
    %cst_22 = arith.constant 0.000000e+00 : f32
    %33 = vector.broadcast %cst_22 : f32 to vector<2x4xf32>
    %34 = arith.subf %33, %32 : vector<2x4xf32>
    %35 = math.exp %34 : vector<2x4xf32>
    %36 = math.log1p %35 : vector<2x4xf32>
    %37 = arith.addf %31, %36 : vector<2x4xf32>
    %c0_23 = arith.constant 0 : index
    %c0_24 = arith.constant 0 : index
    %38 = vector.load %arg9[%c0_23, %c0_24] : memref<2x4xf32, #tpu.memory_space<vmem>>, vector<2x4xf32>
    tpu.vector_store %arg9[%c0_23, %c0_24], %25 {strides = array<i32>} : memref<2x4xf32, #tpu.memory_space<vmem>>, vector<2x4xf32>,
    %c0_25 = arith.constant 0 : index
    %c0_26 = arith.constant 0 : index
    %39 = vector.load %arg10[%c0_25, %c0_26] : memref<2x4xf32, #tpu.memory_space<vmem>>, vector<2x4xf32>
    tpu.vector_store %arg10[%c0_25, %c0_26], %37 {strides = array<i32>} : memref<2x4xf32, #tpu.memory_space<vmem>>, vector<2x4xf32>,
    return
  }
  func.func @transform_0(%arg0: i32) -> (i32, i32) {
    %c0_i32 = arith.constant 0 : i32
    %c0_i32_0 = arith.constant 0 : i32
    return %arg0, %c0_i32 : i32, i32
  }
  func.func @transform_1(%arg0: i32) -> (i32, i32) {
    %c0_i32 = arith.constant 0 : i32
    %c0_i32_0 = arith.constant 0 : i32
    return %arg0, %c0_i32 : i32, i32
  }
  func.func @transform_2(%arg0: i32) -> (i32, i32) {
    %c0_i32 = arith.constant 0 : i32
    %c0_i32_0 = arith.constant 0 : i32
    %c0_i32_1 = arith.constant 0 : i32
    return %c0_i32, %c0_i32_0 : i32, i32
  }
  func.func @transform_3(%arg0: i32) -> (i32, i32) {
    %c0_i32 = arith.constant 0 : i32
    %c0_i32_0 = arith.constant 0 : i32
    %c0_i32_1 = arith.constant 0 : i32
    return %c0_i32, %c0_i32_0 : i32, i32
  }
  func.func @transform_4(%arg0: i32) -> (i32, i32) {
    %c0_i32 = arith.constant 0 : i32
    %c0_i32_0 = arith.constant 0 : i32
    %c0_i32_1 = arith.constant 0 : i32
    return %c0_i32, %c0_i32_0 : i32, i32
  }
  func.func @transform_5(%arg0: i32) -> (i32, i32) {
    %c0_i32 = arith.constant 0 : i32
    %c0_i32_0 = arith.constant 0 : i32
    %c0_i32_1 = arith.constant 0 : i32
    return %c0_i32, %c0_i32_0 : i32, i32
  }
  func.func @transform_6(%arg0: i32) -> (i32, i32) {
    %c0_i32 = arith.constant 0 : i32
    %c0_i32_0 = arith.constant 0 : i32
    %c0_i32_1 = arith.constant 0 : i32
    return %c0_i32, %c0_i32_0 : i32, i32
  }
  func.func @transform_7(%arg0: i32) -> (i32, i32) {
    %c0_i32 = arith.constant 0 : i32
    %c0_i32_0 = arith.constant 0 : i32
    %c0_i32_1 = arith.constant 0 : i32
    return %c0_i32, %c0_i32_0 : i32, i32
  }
  func.func @transform_8(%arg0: i32) -> (i32, i32) {
    %c0_i32 = arith.constant 0 : i32
    %c0_i32_0 = arith.constant 0 : i32
    return %arg0, %c0_i32 : i32, i32
  }
  func.func @transform_9(%arg0: i32) -> (i32, i32) {
    %c0_i32 = arith.constant 0 : i32
    %c0_i32_0 = arith.constant 0 : i32
    return %arg0, %c0_i32 : i32, i32
  }
}

</mosaic_0001>

<bundles_post_ra>
// kernel: tpu_custom_call.1
= control target key start
LH: loop header
LB: loop body
LE: loop exit
PB: predicated region body
PF: predicated region fallthrough
CT: control target
= control target key end

     0   :  { %15 = vsyncpa [#allocation3], 0  ;;  %vm42_vm0 = vcmask 1041408   ;;  %vm38_vm1 = vcmask 15360   ;;  %v612_v1 = vmov 0.0   ;;  %vm613_vm2 = vmmov 0   ;;  %s736_s0 = inlined_call_operand.vmem [shape: f32[2,4], index: 0, kind: input, shape index: {}]   ;;  %s737_s1 = inlined_call_operand.vmem [shape: f32[2,2], index: 1, kind: input, shape index: {}]   ;;  %s738_s2 = inlined_call_operand.vmem [shape: f32[4,32], index: 2, kind: input, shape index: {}]   ;;  %s739_s3 = inlined_call_operand.vmem [shape: f32[2,32], index: 3, kind: input, shape index: {}]   ;;  %s740_s4 = inlined_call_operand.vmem [shape: f32[32,32], index: 4, kind: input, shape index: {}]   ;;  %s741_s5 = inlined_call_operand.vmem [shape: f32[32,4], index: 5, kind: input, shape index: {}]   ;;  %s742_s6 = inlined_call_operand.vmem [shape: f32[32,4], index: 6, kind: input, shape index: {}]   ;;  %s743_s7 = inlined_call_operand.vmem [shape: f32[1,72], index: 7, kind: input, shape index: {}]   ;;  %s744_s8 = inlined_call_operand.hbm [shape: f32[2,4], index: 8, kind: output, shape index: {0}]   ;;  %s745_s9 = inlined_call_operand.hbm [shape: f32[2,4], index: 9, kind: output, shape index: {1}]  }
   0x1   :  { %v37_v0 = vld [vmem:[%s739_s3] sm:$0x3]  ;;  %514 = vmatprep.subr.mxu1 %v612_v1  ;;  %516 = vmatprep.mubr.msk.f32.mxu1 %vm613_vm2, %v612_v1  ;;  %vm120_vm3 = vcmask 1043456  }
   0x2   :  { %v35_v2 = vld [vmem:[%s737_s1] sm:$0x3]  ;;  %515 = vmatpush3.msk.msra.mxu1 %vm42_vm0, %v37_v0  ;;  %524 = vmatprep.subr.mxu0 %v612_v1 }
   0x3   :  { %v36_v3 = vld [vmem:[%s738_s2] sm:$0xf] }
   0x4   :  { %16 = vsyncpa [#allocation5], 0  ;;  %517 = vmatmul.mubr.msk.f32.vlgmr.msra.gmra.mxu1 %vm38_vm1, %v35_v2  ;;  %519 = vmatprep.subr.mxu1 %v612_v1  ;;  %v34_v4 = vld [vmem:[%s736_s0] sm:$0x3]  ;;  %vm116_vm4 = vcmask 31744   ;;  %v205_v5 = vld [vmem:[%s740_s4 + $0x18] sm:$0xff] }
   0x5   :  { %520 = vmatpush3.msk.msra.mxu1 %vm120_vm3, %v36_v3  ;;  %521 = vmatprep.mubr.msk.f32.mxu1 %vm613_vm2, %v612_v1  ;;  %v204_v6 = vld [vmem:[%s740_s4 + $0x10] sm:$0xff]  ;;  %v203_v7 = vld [vmem:[%s740_s4 + $0x8] sm:$0xff]  ;;  %v202_v8 = vld [vmem:[%s740_s4] sm:$0xff]  ;;  %s614_s25 = smov 96   ;;  %vm209_vm5 = vcmask 261120   ;;  %s615_s1 = smov 64  }
   0x6   :  { %532 = vmatprep.mubr.msk.f32.mxu0 %vm613_vm2, %v612_v1  ;;  %535 = vmatprep.subr.mxu1 %v612_v1  ;;  %v491_v9 = vld [vmem:[%s743_s7] ss:$0 sm:$0xff]  ;;  %v287_v10 = vld [vmem:[%s741_s5 + $0x18] sm:$0xff]  ;;  %v286_v11 = vld [vmem:[%s741_s5 + $0x10] sm:$0xff]  ;;  %s616_s2 = smov 60   ;;  %vm456_vm6 = vcmask 25600  }
   0x7   :  { %525 = vmatpush3.msra.mxu0 %v205_v5  ;;  %206 = vrot.lane.b32.xlu0 %v491_v9, %s614_s25  ;;  %v367_v19 = vld [vmem:[%s742_s6 + $0x18] sm:$0xff]  ;;  %v366_v20 = vld [vmem:[%s742_s6 + $0x10] sm:$0xff]  ;;  %v285_v21 = vld [vmem:[%s741_s5 + $0x8] sm:$0xff] }
   0x8   :  { %522 = vmatmul.mubr.msk.f32.vlgmr.msra.gmra.mxu1 %vm116_vm4, %v34_v4  ;;  %526 = vmatprep.subr.mxu0 %v612_v1  ;;  %v365_v22 = vld [vmem:[%s742_s6 + $0x8] sm:$0xff]  ;;  %v284_v23 = vld [vmem:[%s741_s5] sm:$0xff]  ;;  %s617_s5 = smov [#allocation2]  }
   0x9   :  { %543 = vmatprep.mubr.msk.f32.mxu1 %vm613_vm2, %v612_v1  ;;  %527 = vmatpush3.msra.mxu0 %v204_v6  ;;  %v364_v24 = vld [vmem:[%s742_s6] sm:$0xff]  ;;  %s465_s16 = sshll.u32 %s617_s5, 4  ;;  %s466_s16 = int_to_ptr.vmem [resolvable:$true] %s465_s16 }
   0xa   :  { %528 = vmatprep.subr.mxu0 %v612_v1  ;;  %536 = vmatpush3.msra.mxu1 %v287_v10  ;;  %s568_s6 = scalar_lea.vmem %s466_s16, 32  ;;  %p573_p1 = scmp.lt.s32.totalorder %s466_s16, %s466_s16 }
   0xb   :  { %529 = vmatpush3.msra.mxu0 %v203_v7  ;;  %537 = vmatprep.subr.mxu1 %v612_v1  ;;  %p569_p0 = scmp.ne.s32.totalorder %s466_s16, %s568_s6  ;;  %p574_p2 = scmp.lt.s32.totalorder %s568_s6, %s568_s6 }
   0xc   :  { %530 = vmatprep.subr.mxu0 %v612_v1  ;;  %538 = vmatpush3.msra.mxu1 %v286_v11 }
   0xd   :  { %531 = vmatpush3.msra.mxu0 %v202_v8  ;;  %539 = vmatprep.subr.mxu1 %v612_v1  ;;  %p575_p3 = por %p574_p2, %p573_p1 }
   0xe   :  { %546 = vmatprep.subr.mxu0 %v612_v1  ;;  %540 = vmatpush3.msra.mxu1 %v285_v21 }
   0xf   :  { %541 = vmatprep.subr.mxu1 %v612_v1  ;;  %288 = vrot.lane.b32.xlu1 %v491_v9, %s615_s1  ;;  %p576_p4 = pnand %p575_p3, %p569_p0 }
  0x10   :  { %542 = vmatpush3.msra.mxu1 %v284_v23  ;;  %368 = vrot.lane.b32.xlu0 %v491_v9, %s616_s2 }
  0x79   :  { %v207_v25 = vpop.permute.xlu0 %206 }
  0x81   :  { %v289_v30 = vpop.permute.xlu1 %288 }
  0x82   :  { %v369_v31 = vpop.permute.xlu0 %368 }
  0xc4   :  { %v112_v12 = vpop.f32.mrf.mxu1 }
  0xc6   :  { %v518_v13 = vpop.f32.mrf.mxu1 }
  0xc8   :  { %v190_v14 = vpop.f32.mrf.mxu1 }
  0xc9   :  { %v191_v15 = vadd.f32 %v190_v14, %v112_v12 }
  0xca   :  { %v523_v16 = vpop.f32.mrf.mxu1 }
  0xcb   :  { %v200_v17 = vadd.f32 %v491_v9, %v191_v15 }
  0xcd   :  { %v201_v18 = vmax.f32 %v200_v17, 0.0 }
  0xcf   :  { %533 = vmatmul.mubr.msk.f32.vlgmr.msra.gmra.mxu0 %vm209_vm5, %v201_v18 }
  0xd0   :  { %547 = vmatpush3.msra.mxu0 %v367_v19  ;;  %554 = vmatprep.mubr.msk.f32.mxu0 %vm613_vm2, %v612_v1 }
  0xd1   :  { %548 = vmatprep.subr.mxu0 %v612_v1 }
  0xd2   :  { %549 = vmatpush3.msra.mxu0 %v366_v20 }
  0xd3   :  { %550 = vmatprep.subr.mxu0 %v612_v1 }
  0xd4   :  { %551 = vmatpush3.msra.mxu0 %v365_v22 }
  0xd5   :  { %552 = vmatprep.subr.mxu0 %v612_v1 }
  0xd6   :  { %553 = vmatpush3.msra.mxu0 %v364_v24 }
 0x18f   :  { %v279_v26 = vpop.f32.mrf.mxu0 }
 0x190   :  { %v280_v27 = vadd.f32 %v279_v26, %v207_v25 }
 0x191   :  { %v534_v28 = vpop.f32.mrf.mxu0 }
 0x192   :  { %v283_v29 = vmax.f32 %v280_v27, 0.0 }
 0x194   :  { %544 = vmatmul.mubr.msk.f32.vlgmr.msra.gmra.mxu1 %vm209_vm5, %v283_v29  ;;  %555 = vmatmul.mubr.msk.f32.vlgmr.msra.gmra.mxu0 %vm209_vm5, %v283_v29 }
 0x254   :  { %v360_v32 = vpop.f32.mrf.mxu1  ;;  %v437_v33 = vpop.f32.mrf.mxu0 }
 0x255   :  { %v361_v34 = vadd.f32 %v360_v32, %v289_v30  ;;  %v438_v35 = vadd.f32 %v437_v33, %v369_v31 }
 0x256   :  { %v545_v36 = vpop.f32.mrf.mxu1  ;;  %v556_v37 = vpop.f32.mrf.mxu0 }
 0x257   :  { %v442_v38 = vand.u32 2147483647, %v438_v35  ;;  %457 = vst.msk [vmem:[#allocation2] sm:$0x3] %vm456_vm6, %v361_v34 }
 0x258   :  { %579 = shalt.err (!%p576_p4)
}
 0x259   :  { %468 = dma.vmem_to_hbm [thread:$0]  %s466_s16, 32, %s744_s8, [#allocation3]   ;;  %v443_v39 = vsub.f32 0.0, %v442_v38  ;;  %v441_v49 = vmax.f32 %v438_v35, 0.0 }
 0x25a   :  { %s618_s18 = smov [#allocation4]  }
 0x25b   :  { %v444_v40 = vmul.f32 1.442695, %v443_v39  ;;  %s475_s19 = sshll.u32 %s618_s18, 4  ;;  %s476_s19 = int_to_ptr.vmem [resolvable:$true] %s475_s19 }
 0x25c   :  { %s588_s8 = scalar_lea.vmem %s476_s19, 32  ;;  %p593_p6 = scmp.lt.s32.totalorder %s476_s19, %s476_s19 }
 0x25d   :  { %564 = vpow2.f32 %v444_v40  ;;  %p589_p5 = scmp.ne.s32.totalorder %s476_s19, %s588_s8  ;;  %p594_p7 = scmp.lt.s32.totalorder %s588_s8, %s588_s8 }
 0x25f   :  { %p595_p8 = por %p594_p7, %p593_p6 }
 0x261   :  { %p596_p9 = pnand %p595_p8, %p589_p5 }
 0x26a   :  { %v565_v41 = vpop.eup %564 }
 0x26b   :  { %v446_v42 = vadd.f32 1.0, %v565_v41  ;;  %v449_v43 = vmul.f32 -0.5, %v565_v41  ;;  %v452_v45 = vand.u32 2147483647, %v565_v41 }
 0x26d   :  { %566 = vlog2.f32 %v446_v42  ;;  %v450_v44 = vadd.f32 1.0, %v449_v43  ;;  %vm453_vm7 = vcmp.lt.f32.partialorder %v452_v45, 0.0004427343 }
 0x26f   :  { %v451_v48 = vmul.f32 %v565_v41, %v450_v44 }
 0x27a   :  { %v567_v46 = vpop.eup %566 }
 0x27b   :  { %v448_v47 = vmul.f32 0.6931472, %v567_v46 }
 0x27d   :  { %v454_v50 = vsel %vm453_vm7, %v451_v48, %v448_v47 }
 0x27e   :  { %v455_v51 = vadd.f32 %v454_v50, %v441_v49 }
 0x280   :  { %458 = vst.msk [vmem:[#allocation4] sm:$0x3] %vm456_vm6, %v455_v51 }
 0x281   :  { %599 = shalt.err (!%p596_p9)
}
 0x282   :  { %478 = dma.vmem_to_hbm [thread:$0]  %s476_s19, 32, %s745_s9, [#allocation5]  }
 0x283   :  { %608 = dma.done.wait [#allocation3], 32  }
 0x284   :  { %609 = vsyncadd [#allocation3], 4294967264 }
 0x285   :  { %610 = dma.done.wait [#allocation5], 32  }
 0x286   :  { %611 = vsyncadd [#allocation5], 4294967264 }
 0x287   :  { %485 = vsyncpa [#allocation3], 1 }
 0x288   :  { %486 = vsyncpa [#allocation5], 1 }

</bundles_post_ra>
